<compile_context>
chip_gen: v7x
topology: tpu7x:2x2x1
jax: 0.10.0
libtpu: 0.0.40
codegen_flags: <defaults>
</compile_context>

<pallas_src>
import functools

import jax
import jax.numpy as jnp
from jax import lax
from jax.experimental import pallas as pl
from jax.experimental.pallas import tpu as pltpu


_INV_SQRT2 = 0.7071067811865476


def _erf_f32(x):
    # Abramowitz & Stegun 7.1.26 rational approximation, |error| <= 1.5e-7.
    a1, a2, a3, a4, a5 = (0.254829592, -0.284496736, 1.421413741,
                          -1.453152027, 1.061405429)
    p = 0.3275911
    z = jnp.abs(x)
    t = 1.0 / (1.0 + p * z)
    poly = ((((a5 * t + a4) * t + a3) * t + a2) * t + a1) * t
    y = 1.0 - poly * jnp.exp(-z * z)
    return jnp.where(x < 0, -y, y)


def _lm_head_kernel(x_ref, wd_ref, bd_ref, g_ref, beta_ref, wdec_ref,
                    bdec_ref, out_ref, h_ref, *, eps):
    j = pl.program_id(1)

    # dense -> gelu -> layer_norm computed once per row tile (vocab step 0);
    # the bf16 result stays resident in VMEM scratch for all vocab tiles.
    # NOTE: this reuse is only valid while the vocab axis is "arbitrary"
    # (serial, innermost) -- do not mark it parallel/core_parallel.
    @pl.when(j == 0)
    def _():
        x = x_ref[...].astype(jnp.bfloat16)                       # (TR, H)
        # dense: x @ Wd^T + bd   (Wd kept in PyTorch (out, in) layout, bf16)
        h = lax.dot_general(
            x, wd_ref[...],
            dimension_numbers=(((1,), (1,)), ((), ())),
            preferred_element_type=jnp.float32)
        h = h + bd_ref[...]                                       # f32
        # exact (erf-form) gelu, f32
        h = 0.5 * h * (1.0 + _erf_f32(h * _INV_SQRT2))
        # layer norm over hidden dim, f32
        mu = jnp.mean(h, axis=-1, keepdims=True)
        var = jnp.mean(jnp.square(h - mu), axis=-1, keepdims=True)
        h = (h - mu) * lax.rsqrt(var + eps)
        h = h * g_ref[...] + beta_ref[...]
        h_ref[...] = h.astype(h_ref.dtype)                        # bf16 scratch

    # decoder tile: h @ Wdec_tile^T + b_tile  -> (TR, TV), f32 accumulation.
    y = lax.dot_general(
        h_ref[...], wdec_ref[...],
        dimension_numbers=(((1,), (1,)), ((), ())),
        preferred_element_type=jnp.float32)
    y = y + bdec_ref[...]
    out_ref[...] = y.astype(out_ref.dtype)


def _round_up(n, m):
    return ((n + m - 1) // m) * m


def prepare_lm_head_weights(w_dense, b_dense, ln_weight, ln_bias,
                            w_decoder, b_decoder, *, vocab_tile=1024):
    """One-time weight preparation (do this OUTSIDE the hot path, at load time).

    Casts the matmul weights to bf16 and pads the decoder weight / tied bias
    up to a vocab-tile multiple once, so the per-call forward never pads or
    copies the large (V, H) tensor.
      w_dense:   (H, H)  PyTorch (out, in)     b_dense: (H,)
      ln_weight/ln_bias: (H,)
      w_decoder: (V, H)  PyTorch (out, in)     b_decoder: (V,) (tied bias)
    """
    assert vocab_tile % 128 == 0
    V, H = w_decoder.shape
    TV = min(vocab_tile, _round_up(V, 128))
    v_p = _round_up(V, TV)

    w_dec = w_decoder
    b_dec = b_decoder
    if v_p != V:
        w_dec = jnp.pad(w_dec, ((0, v_p - V), (0, 0)))
        b_dec = jnp.pad(b_dec, ((0, v_p - V),))

    return dict(
        w_dense=w_dense.astype(jnp.bfloat16),             # (H, H) bf16
        b_dense=b_dense.reshape(1, H).astype(jnp.float32),
        ln_w=ln_weight.reshape(1, H).astype(jnp.float32),
        ln_b=ln_bias.reshape(1, H).astype(jnp.float32),
        w_dec=w_dec.astype(jnp.bfloat16),                 # (v_p, H) bf16
        b_dec=b_dec.reshape(1, v_p).astype(jnp.float32),
        hidden=H, vocab=V, vocab_padded=v_p, vocab_tile=TV,
    )


def _default_vmem_limit():
    # ~100 MiB on v5e/v6e (128 MiB physical), ~48 MiB on v7x (64 MiB physical).
    try:
        cap = pltpu.get_tpu_info().vmem_capacity_bytes
        return int(min(100 << 20, int(cap * 0.75)))
    except Exception:
        return 64 << 20


def xlmr_lm_head(features, params, *, eps=1e-5, row_tile=512,
                 out_dtype=None, vmem_limit_bytes=None, return_padded=False):
    """features: (..., H) -> logits (..., V) (or (..., V_padded) if return_padded)."""
    assert row_tile % 8 == 0
    H = params["hidden"]
    V = params["vocab"]
    v_p = params["vocab_padded"]
    TV = params["vocab_tile"]
    assert features.shape[-1] == H
    lead = features.shape[:-1]
    if out_dtype is None:
        out_dtype = features.dtype

    x2d = features.reshape(-1, H)
    rows = x2d.shape[0]

    TR = min(row_tile, _round_up(rows, 8))
    rows_p = _round_up(rows, TR)
    if rows_p != rows:                      # only the small activation is padded
        x2d = jnp.pad(x2d, ((0, rows_p - rows), (0, 0)))

    grid = (rows_p // TR, v_p // TV)
    row_tiles = grid[0]

    if vmem_limit_bytes is None:
        vmem_limit_bytes = _default_vmem_limit()

    in_bytes = jnp.dtype(features.dtype).itemsize
    out_bytes = jnp.dtype(out_dtype).itemsize
    cost = pl.CostEstimate(
        flops=2 * rows_p * H * (H + v_p),
        transcendentals=rows_p * H,
        bytes_accessed=int(rows_p * H * in_bytes          # activations in
                           + H * H * 2                    # dense weight (bf16, fetched once)
                           + row_tiles * v_p * H * 2      # decoder weight re-streamed per row tile
                           + rows_p * v_p * out_bytes     # logits writeback
                           + 4 * (3 * H + v_p)),          # biases / LN params
    )

    out = pl.pallas_call(
        functools.partial(_lm_head_kernel, eps=float(eps)),
        out_shape=jax.ShapeDtypeStruct((rows_p, v_p), out_dtype),
        grid=grid,
        in_specs=[
            pl.BlockSpec((TR, H), lambda i, j: (i, 0)),   # token rows tile
            pl.BlockSpec((H, H), lambda i, j: (0, 0)),    # dense weight (resident, bf16)
            pl.BlockSpec((1, H), lambda i, j: (0, 0)),    # dense bias (f32)
            pl.BlockSpec((1, H), lambda i, j: (0, 0)),    # LN gamma (f32)
            pl.BlockSpec((1, H), lambda i, j: (0, 0)),    # LN beta (f32)
            pl.BlockSpec((TV, H), lambda i, j: (j, 0)),   # decoder weight tile (bf16)
            pl.BlockSpec((1, TV), lambda i, j: (0, j)),   # decoder (tied) bias tile
        ],
        out_specs=pl.BlockSpec((TR, TV), lambda i, j: (i, j)),
        scratch_shapes=[pltpu.VMEM((TR, H), jnp.bfloat16)],   # h kept in MXU dtype
        compiler_params=pltpu.CompilerParams(
            dimension_semantics=("parallel", "arbitrary"),
            vmem_limit_bytes=int(vmem_limit_bytes)),
        cost_estimate=cost,
    )(x2d, params["w_dense"], params["b_dense"], params["ln_w"],
      params["ln_b"], params["w_dec"], params["b_dec"])

    out = out[:rows] if rows_p != rows else out
    if not return_padded and v_p != V:
        # At production sizes prefer return_padded=True and slice lazily
        # downstream to avoid an extra rows x V HBM copy.
        out = out[:, :V]
    last = v_p if return_padded else V
    return out.reshape(*lead, last)


def _reference(features, w_dense, b_dense, g, beta, w_dec, b_dec, eps):
    hp = lax.Precision.HIGHEST
    x = jnp.dot(features, w_dense.T, precision=hp) + b_dense
    x = 0.5 * x * (1.0 + jax.scipy.special.erf(x * _INV_SQRT2))
    mu = jnp.mean(x, axis=-1, keepdims=True)
    var = jnp.mean(jnp.square(x - mu), axis=-1, keepdims=True)
    x = (x - mu) * lax.rsqrt(var + eps)
    x = x * g + beta
    return jnp.dot(x, w_dec.T, precision=hp) + b_dec


if __name__ == "__main__":
    # Small shapes consistent with the module: batch=2, seq=8, hidden=128, vocab=256.
    B, S, H, V = 2, 8, 128, 256
    key = jax.random.PRNGKey(0)
    ks = jax.random.split(key, 7)

    features = jax.random.normal(ks[0], (B, S, H), dtype=jnp.float32)
    w_dense = jax.random.normal(ks[1], (H, H), dtype=jnp.float32) * 0.05
    b_dense = jax.random.normal(ks[2], (H,), dtype=jnp.float32) * 0.05
    ln_w = 1.0 + 0.1 * jax.random.normal(ks[3], (H,), dtype=jnp.float32)
    ln_b = 0.1 * jax.random.normal(ks[4], (H,), dtype=jnp.float32)
    w_dec = jax.random.normal(ks[5], (V, H), dtype=jnp.float32) * 0.05
    b_dec = jax.random.normal(ks[6], (V,), dtype=jnp.float32) * 0.05

    # One-time weight prep (bf16 cast + vocab padding) outside the hot path.
    # Small tiles so the test exercises both grid axes (grid = (2, 2)) and the
    # scratch-reuse path across vocab steps.
    params = prepare_lm_head_weights(w_dense, b_dense, ln_w, ln_b, w_dec, b_dec,
                                     vocab_tile=128)
    out = xlmr_lm_head(features, params, eps=1e-5, row_tile=8)
    out = jax.block_until_ready(out)

    ref = _reference(features, w_dense, b_dense, ln_w, ln_b, w_dec, b_dec, 1e-5)
    assert out.shape == (B, S, V), out.shape
    # Tolerance reflects the bf16 weight/activation streaming (f32 accumulation)
    # vs the HIGHEST-precision f32 XLA reference; structural errors would be
    # orders of magnitude larger.
    err = jnp.max(jnp.abs(out - ref))
    assert jnp.allclose(out, ref, atol=5e-2, rtol=5e-2), f"max abs err {err}"
    print("KERNEL_OK")
</pallas_src>

<mosaic_0001>
module attributes {stable_mosaic.version = 11 : i64} {
  func.func @_lm_head_kernel(%arg0: i32, %arg1: i32, %arg2: memref<8x128xf32, #tpu.memory_space<vmem>>, %arg3: memref<128x128xbf16, #tpu.memory_space<vmem>>, %arg4: memref<1x128xf32, #tpu.memory_space<vmem>>, %arg5: memref<1x128xf32, #tpu.memory_space<vmem>>, %arg6: memref<1x128xf32, #tpu.memory_space<vmem>>, %arg7: memref<128x128xbf16, #tpu.memory_space<vmem>>, %arg8: memref<1x128xf32, #tpu.memory_space<vmem>>, %arg9: memref<8x128xf32, #tpu.memory_space<vmem>>, %arg10: memref<8x128xbf16, #tpu.memory_space<vmem>>) attributes {dimension_semantics = [#tpu.dimension_semantics<parallel>, #tpu.dimension_semantics<arbitrary>], iteration_bounds = array<i64: 2, 2>, scalar_prefetch = 0 : i64, scratch_operands = 1 : i64, tpu.core_type = #tpu.core_type<tc>, window_params = [{transform_indices = @transform_0, window_bounds = array<i64: 8, 128>}, {pipeline_mode = #tpu.pipeline_mode<synchronous>, transform_indices = @transform_1, window_bounds = array<i64: 128, 128>}, {pipeline_mode = #tpu.pipeline_mode<synchronous>, transform_indices = @transform_2, window_bounds = array<i64: 1, 128>}, {pipeline_mode = #tpu.pipeline_mode<synchronous>, transform_indices = @transform_3, window_bounds = array<i64: 1, 128>}, {pipeline_mode = #tpu.pipeline_mode<synchronous>, transform_indices = @transform_4, window_bounds = array<i64: 1, 128>}, {transform_indices = @transform_5, window_bounds = array<i64: 128, 128>}, {transform_indices = @transform_6, window_bounds = array<i64: 1, 128>}, {transform_indices = @transform_7, window_bounds = array<i64: 8, 128>}]} {
    %c0_i32 = arith.constant 0 : i32
    %0 = arith.cmpi eq, %arg1, %c0_i32 : i32
    %1 = arith.extui %0 : i1 to i32
    %c0_i32_0 = arith.constant 0 : i32
    %2 = arith.cmpi ne, %1, %c0_i32_0 : i32
    scf.if %2 {
      %c0_8 = arith.constant 0 : index
      %c0_9 = arith.constant 0 : index
      %10 = vector.load %arg2[%c0_8, %c0_9] : memref<8x128xf32, #tpu.memory_space<vmem>>, vector<8x128xf32>
      %11 = arith.truncf %10 : vector<8x128xf32> to vector<8x128xbf16>
      %c0_10 = arith.constant 0 : index
      %c0_11 = arith.constant 0 : index
      %12 = vector.load %arg3[%c0_10, %c0_11] : memref<128x128xbf16, #tpu.memory_space<vmem>>, vector<128x128xbf16>
      %cst_12 = arith.constant dense<0.000000e+00> : vector<8x128xf32>
      %13 = tpu.matmul %11, %12, %cst_12 {dimension_numbers = #tpu.dot_dimension_numbers<[1], [1], [0], [0], [0, 0, 1, 0], [], []>} : vector<8x128xbf16>, vector<128x128xbf16>, vector<8x128xf32> -> vector<8x128xf32>
      %c0_13 = arith.constant 0 : index
      %c0_14 = arith.constant 0 : index
      %14 = vector.load %arg4[%c0_13, %c0_14] : memref<1x128xf32, #tpu.memory_space<vmem>>, vector<1x128xf32>
      %15 = vector.broadcast %14 : vector<1x128xf32> to vector<8x128xf32>
      %16 = arith.addf %13, %15 : vector<8x128xf32>
      %cst_15 = arith.constant 5.000000e-01 : f32
      %17 = vector.broadcast %cst_15 : f32 to vector<8x128xf32>
      %18 = arith.mulf %17, %16 : vector<8x128xf32>
      %cst_16 = arith.constant 0.707106769 : f32
      %19 = vector.broadcast %cst_16 : f32 to vector<8x128xf32>
      %20 = arith.mulf %16, %19 : vector<8x128xf32>
      %21 = math.absf %20 : vector<8x128xf32>
      %cst_17 = arith.constant 0.327591091 : f32
      %22 = vector.broadcast %cst_17 : f32 to vector<8x128xf32>
      %23 = arith.mulf %22, %21 : vector<8x128xf32>
      %cst_18 = arith.constant 1.000000e+00 : f32
      %24 = vector.broadcast %cst_18 : f32 to vector<8x128xf32>
      %25 = arith.addf %24, %23 : vector<8x128xf32>
      %cst_19 = arith.constant 1.000000e+00 : f32
      %26 = vector.broadcast %cst_19 : f32 to vector<8x128xf32>
      %27 = arith.divf %26, %25 : vector<8x128xf32>
      %cst_20 = arith.constant 1.06140542 : f32
      %28 = vector.broadcast %cst_20 : f32 to vector<8x128xf32>
      %29 = arith.mulf %28, %27 : vector<8x128xf32>
      %cst_21 = arith.constant -1.45315206 : f32
      %30 = vector.broadcast %cst_21 : f32 to vector<8x128xf32>
      %31 = arith.addf %29, %30 : vector<8x128xf32>
      %32 = arith.mulf %31, %27 : vector<8x128xf32>
      %cst_22 = arith.constant 1.42141378 : f32
      %33 = vector.broadcast %cst_22 : f32 to vector<8x128xf32>
      %34 = arith.addf %32, %33 : vector<8x128xf32>
      %35 = arith.mulf %34, %27 : vector<8x128xf32>
      %cst_23 = arith.constant -0.284496725 : f32
      %36 = vector.broadcast %cst_23 : f32 to vector<8x128xf32>
      %37 = arith.addf %35, %36 : vector<8x128xf32>
      %38 = arith.mulf %37, %27 : vector<8x128xf32>
      %cst_24 = arith.constant 0.254829586 : f32
      %39 = vector.broadcast %cst_24 : f32 to vector<8x128xf32>
      %40 = arith.addf %38, %39 : vector<8x128xf32>
      %41 = arith.mulf %40, %27 : vector<8x128xf32>
      %cst_25 = arith.constant 0.000000e+00 : f32
      %42 = vector.broadcast %cst_25 : f32 to vector<8x128xf32>
      %43 = arith.subf %42, %21 : vector<8x128xf32>
      %44 = arith.mulf %43, %21 : vector<8x128xf32>
      %45 = math.exp %44 : vector<8x128xf32>
      %46 = arith.mulf %41, %45 : vector<8x128xf32>
      %cst_26 = arith.constant 1.000000e+00 : f32
      %47 = vector.broadcast %cst_26 : f32 to vector<8x128xf32>
      %48 = arith.subf %47, %46 : vector<8x128xf32>
      %cst_27 = arith.constant 0.000000e+00 : f32
      %49 = vector.broadcast %cst_27 : f32 to vector<8x128xf32>
      %50 = arith.cmpf olt, %20, %49 : vector<8x128xf32>
      %cst_28 = arith.constant 0.000000e+00 : f32
      %51 = vector.broadcast %cst_28 : f32 to vector<8x128xf32>
      %52 = arith.subf %51, %48 : vector<8x128xf32>
      %53 = arith.select %50, %52, %48 : vector<8x128xi1>, vector<8x128xf32>
      %cst_29 = arith.constant 1.000000e+00 : f32
      %54 = vector.broadcast %cst_29 : f32 to vector<8x128xf32>
      %55 = arith.addf %54, %53 : vector<8x128xf32>
      %56 = arith.mulf %18, %55 : vector<8x128xf32>
      %cst_30 = arith.constant dense<0.000000e+00> : vector<8xf32>
      %57 = vector.multi_reduction <add>, %56, %cst_30 [1] : vector<8x128xf32> to vector<8xf32>
      %58 = vector.shape_cast %57 : vector<8xf32> to vector<8x1xf32>
      %cst_31 = arith.constant 1.280000e+02 : f32
      %59 = vector.broadcast %cst_31 : f32 to vector<8x1xf32>
      %60 = arith.divf %58, %59 : vector<8x1xf32>
      %61 = vector.broadcast %60 : vector<8x1xf32> to vector<8x128xf32>
      %62 = arith.subf %56, %61 : vector<8x128xf32>
      %63 = arith.mulf %62, %62 : vector<8x128xf32>
      %cst_32 = arith.constant dense<0.000000e+00> : vector<8xf32>
      %64 = vector.multi_reduction <add>, %63, %cst_32 [1] : vector<8x128xf32> to vector<8xf32>
      %65 = vector.shape_cast %64 : vector<8xf32> to vector<8x1xf32>
      %cst_33 = arith.constant 1.280000e+02 : f32
      %66 = vector.broadcast %cst_33 : f32 to vector<8x1xf32>
      %67 = arith.divf %65, %66 : vector<8x1xf32>
      %68 = vector.broadcast %60 : vector<8x1xf32> to vector<8x128xf32>
      %69 = arith.subf %56, %68 : vector<8x128xf32>
      %cst_34 = arith.constant 9.99999974E-6 : f32
      %70 = vector.broadcast %cst_34 : f32 to vector<8x1xf32>
      %71 = arith.addf %67, %70 : vector<8x1xf32>
      %72 = math.rsqrt %71 : vector<8x1xf32>
      %73 = vector.broadcast %72 : vector<8x1xf32> to vector<8x128xf32>
      %74 = arith.mulf %69, %73 : vector<8x128xf32>
      %c0_35 = arith.constant 0 : index
      %c0_36 = arith.constant 0 : index
      %75 = vector.load %arg5[%c0_35, %c0_36] : memref<1x128xf32, #tpu.memory_space<vmem>>, vector<1x128xf32>
      %76 = vector.broadcast %75 : vector<1x128xf32> to vector<8x128xf32>
      %77 = arith.mulf %74, %76 : vector<8x128xf32>
      %c0_37 = arith.constant 0 : index
      %c0_38 = arith.constant 0 : index
      %78 = vector.load %arg6[%c0_37, %c0_38] : memref<1x128xf32, #tpu.memory_space<vmem>>, vector<1x128xf32>
      %79 = vector.broadcast %78 : vector<1x128xf32> to vector<8x128xf32>
      %80 = arith.addf %77, %79 : vector<8x128xf32>
      %81 = arith.truncf %80 : vector<8x128xf32> to vector<8x128xbf16>
      %c0_39 = arith.constant 0 : index
      %c0_40 = arith.constant 0 : index
      %82 = vector.load %arg10[%c0_39, %c0_40] : memref<8x128xbf16, #tpu.memory_space<vmem>>, vector<8x128xbf16>
      tpu.vector_store %arg10[%c0_39, %c0_40], %81 {strides = array<i32>} : memref<8x128xbf16, #tpu.memory_space<vmem>>, vector<8x128xbf16>,
    } else {
    }
    %c0 = arith.constant 0 : index
    %c0_1 = arith.constant 0 : index
    %3 = vector.load %arg10[%c0, %c0_1] : memref<8x128xbf16, #tpu.memory_space<vmem>>, vector<8x128xbf16>
    %c0_2 = arith.constant 0 : index
    %c0_3 = arith.constant 0 : index
    %4 = vector.load %arg7[%c0_2, %c0_3] : memref<128x128xbf16, #tpu.memory_space<vmem>>, vector<128x128xbf16>
    %cst = arith.constant dense<0.000000e+00> : vector<8x128xf32>
    %5 = tpu.matmul %3, %4, %cst {dimension_numbers = #tpu.dot_dimension_numbers<[1], [1], [0], [0], [0, 0, 1, 0], [], []>} : vector<8x128xbf16>, vector<128x128xbf16>, vector<8x128xf32> -> vector<8x128xf32>
    %c0_4 = arith.constant 0 : index
    %c0_5 = arith.constant 0 : index
    %6 = vector.load %arg8[%c0_4, %c0_5] : memref<1x128xf32, #tpu.memory_space<vmem>>, vector<1x128xf32>
    %7 = vector.broadcast %6 : vector<1x128xf32> to vector<8x128xf32>
    %8 = arith.addf %5, %7 : vector<8x128xf32>
    %c0_6 = arith.constant 0 : index
    %c0_7 = arith.constant 0 : index
    %9 = vector.load %arg9[%c0_6, %c0_7] : memref<8x128xf32, #tpu.memory_space<vmem>>, vector<8x128xf32>
    tpu.vector_store %arg9[%c0_6, %c0_7], %8 {strides = array<i32>} : memref<8x128xf32, #tpu.memory_space<vmem>>, vector<8x128xf32>,
    return
  }
  func.func @transform_0(%arg0: i32, %arg1: i32) -> (i32, i32) {
    %c0_i32 = arith.constant 0 : i32
    %c0_i32_0 = arith.constant 0 : i32
    return %arg0, %c0_i32 : i32, i32
  }
  func.func @transform_1(%arg0: i32, %arg1: i32) -> (i32, i32) {
    %c0_i32 = arith.constant 0 : i32
    %c0_i32_0 = arith.constant 0 : i32
    %c0_i32_1 = arith.constant 0 : i32
    return %c0_i32, %c0_i32_0 : i32, i32
  }
  func.func @transform_2(%arg0: i32, %arg1: i32) -> (i32, i32) {
    %c0_i32 = arith.constant 0 : i32
    %c0_i32_0 = arith.constant 0 : i32
    %c0_i32_1 = arith.constant 0 : i32
    return %c0_i32, %c0_i32_0 : i32, i32
  }
  func.func @transform_3(%arg0: i32, %arg1: i32) -> (i32, i32) {
    %c0_i32 = arith.constant 0 : i32
    %c0_i32_0 = arith.constant 0 : i32
    %c0_i32_1 = arith.constant 0 : i32
    return %c0_i32, %c0_i32_0 : i32, i32
  }
  func.func @transform_4(%arg0: i32, %arg1: i32) -> (i32, i32) {
    %c0_i32 = arith.constant 0 : i32
    %c0_i32_0 = arith.constant 0 : i32
    %c0_i32_1 = arith.constant 0 : i32
    return %c0_i32, %c0_i32_0 : i32, i32
  }
  func.func @transform_5(%arg0: i32, %arg1: i32) -> (i32, i32) {
    %c0_i32 = arith.constant 0 : i32
    %c0_i32_0 = arith.constant 0 : i32
    return %arg1, %c0_i32 : i32, i32
  }
  func.func @transform_6(%arg0: i32, %arg1: i32) -> (i32, i32) {
    %c0_i32 = arith.constant 0 : i32
    %c0_i32_0 = arith.constant 0 : i32
    return %c0_i32, %arg1 : i32, i32
  }
  func.func @transform_7(%arg0: i32, %arg1: i32) -> (i32, i32) {
    %c0_i32 = arith.constant 0 : i32
    return %arg0, %arg1 : i32, i32
  }
}

</mosaic_0001>

<bundles_post_ra>
// kernel: tpu_custom_call.1
= control target key start
LH: loop header
LB: loop body
LE: loop exit
PB: predicated region body
PF: predicated region fallthrough
CT: control target
= control target key end

     0   :  { %s2119_s0 = inlined_call_operand.hbm [shape: f32[16,128], index: 0, kind: input, shape index: {}]   ;;  %s2120_s1 = inlined_call_operand.hbm [shape: bf16[128,128], index: 1, kind: input, shape index: {}]   ;;  %s2121_s2 = inlined_call_operand.hbm [shape: f32[1,128], index: 2, kind: input, shape index: {}]   ;;  %s2122_s3 = inlined_call_operand.hbm [shape: f32[1,128], index: 3, kind: input, shape index: {}]   ;;  %s2123_s4 = inlined_call_operand.hbm [shape: f32[1,128], index: 4, kind: input, shape index: {}]   ;;  %s2124_s5 = inlined_call_operand.hbm [shape: bf16[256,128], index: 5, kind: input, shape index: {}]   ;;  %s2125_s6 = inlined_call_operand.hbm [shape: f32[1,256], index: 6, kind: input, shape index: {}]   ;;  %s2126_s7 = inlined_call_operand.hbm [shape: f32[16,256], index: 7, kind: output, shape index: {}]  }
   0x1   :  { %2154 = sst [smem:[#allocation30_spill]] %s2119_s0 }
   0x2   :  { %2155 = sst [smem:[#allocation31_spill]] %s2120_s1 }
   0x3   :  { %2156 = sst [smem:[#allocation32_spill]] %s2121_s2 }
   0x4   :  { %2157 = sst [smem:[#allocation33_spill]] %s2122_s3 }
   0x5   :  { %2158 = sst [smem:[#allocation34_spill]] %s2123_s4 }
   0x6   :  { %2159 = sst [smem:[#allocation35_spill]] %s2124_s5 }
   0x7   :  { %2160 = sst [smem:[#allocation36_spill]] %s2125_s6 }
   0x8   :  { %2161 = sst [smem:[#allocation37_spill]] %s2126_s7 }
   0x9   :  { %12 = vsyncpa [#allocation4], 0 }
   0xa   :  { %14 = vsyncpa [#allocation4 + $0x1], 0 }
   0xb   :  { %15 = vsyncpa [#allocation7], 0 }
   0xc   :  { %16 = vsyncpa [#allocation10], 0 }
   0xd   :  { %17 = vsyncpa [#allocation13], 0 }
   0xe   :  { %19 = vsyncpa [#allocation13 + $0x1], 0 }
   0xf   :  { %20 = vsyncpa [#allocation5], 0 }
  0x10   :  { %22 = vsyncpa [#allocation5 + $0x1], 0  ;;  %s1625_s24 = smov 0   ;;  %s1627_s25 = smov 0  }
  0x11   :  { %s1629_s26 = smov 0   ;;  %s1631_s27 = smov 0  }
  0x12   :  { %s1633_s28 = smov 0   ;;  %s1635_s29 = smov 0  }
  0x13   :  { %s1637_s30 = smov 0   ;;  %s1639_s8 = smov 0  }
  0x14   :  { %s1641_s9 = smov 0   ;;  %s1643_s10 = smov 0  }
  0x15   :  { %s1645_s11 = smov 0   ;;  %s1647_s12 = smov 0  }
  0x16   :  { %s1649_s13 = smov 0   ;;  %s1651_s14 = smov 0  }
  0x17 LB: > { %2162 = sst [smem:[#allocation21_spill]] %s1517_s24  ;;  %s1696_s15 = sadd.s32 4294967295, %s1569_s14   ;;  %s1569_s14 = sphi %s1651_s14, %s28_s14   ;;  %s1565_s13 = sphi %s1649_s13, %s2225_s13   ;;  %s1561_s12 = sphi %s1647_s12, %s2236_s12   ;;  %s1557_s11 = sphi %s1645_s11, %s2223_s11   ;;  %s1553_s10 = sphi %s1643_s10, %s2235_s10   ;;  %s1549_s9 = sphi %s1641_s9, %s2234_s9   ;;  %s1545_s8 = sphi %s1639_s8, %s2233_s8   ;;  %s1541_s30 = sphi %s1637_s30, %s2232_s30   ;;  %s1537_s29 = sphi %s1635_s29, %s2231_s29   ;;  %s1533_s28 = sphi %s1633_s28, %s2230_s28   ;;  %s1529_s27 = sphi %s1631_s27, %s2229_s27   ;;  %s1525_s26 = sphi %s1629_s26, %s2228_s26   ;;  %s1521_s25 = sphi %s1627_s25, %s2227_s25   ;;  %s1517_s24 = sphi %s1625_s24, %s2222_s24  }
  0x18   : > { %2163 = sst [smem:[#allocation22_spill]] %s1521_s25  ;;  %p899_p0 = scmp.ge.s32.totalorder %s1569_s14, 1 }
  0x19   : > { %2164 = sst [smem:[#allocation23_spill]] %s1553_s10  ;;  %p2129_p1 = scmp.eq.s32.totalorder %s1696_s15, 0 }
  0x1a   : > { %2165 = sst [smem:[#allocation24_spill]] %s1557_s11  ;;  %p235_p3 = scmp.lt.s32.totalorder %s1569_s14, 5 }
  0x1b   : > { %2166 = sst [smem:[#allocation25_spill]] %s1565_s13  ;;  %s1571_s17 = smov [#allocation6]  }
  0x1c   : > { %p1702_p4 = pnand %p899_p0, %p235_p3  ;;  %s247_s18 = sshll.u32 %s1571_s17, 4  ;;  %s248_s18 = int_to_ptr.vmem [resolvable:$true] %s247_s18 }
  0x1d   : > { %s1572_s20 = smov [#allocation9]   ;;  %s2170_s1 = sld [smem:[#allocation31_spill]] }
  0x1e   : > { %s2167_s16 = scalar_select %p1702_p4, 1, 0 }
  0x1f   : > { %p1028_p5 = pneg %p1702_p4  ;;  %s272_s21 = sshll.u32 %s1572_s20, 4  ;;  %s1714_s21 = int_to_ptr.vmem [resolvable:$true] %s272_s21 }
  0x20   : > { %2168 = sst [smem:[#allocation26_spill]] %s2167_s16 }
  0x21   : > { %p1710_p6 = pnand %p1028_p5, %p2129_p1 }
  0x23   : > { %s2169_s19 = scalar_select %p1710_p6, 1, 0 }
  0x24   : > { %s1209_s7 = scalar_lea.hbm %s2170_s1, 1024  ;;  %p1724_p8 = pneg %p1710_p6 }
  0x25   : > { %p1210_p7 = scmp.ne.s32.totalorder %s2170_s1, %s1209_s7  ;;  %p1216_p11 = scmp.lt.u32.totalorder %s1209_s7, %s2170_s1 }
  0x27   : > { %p1212_p9 = pnand %p1724_p8, %p1210_p7 }
  0x29   : > { %p1213_p10 = pneg %p1212_p9 }
  0x2b   : > { %p1218_p12 = pnand %p1216_p11, %p1213_p10 }
  0x2d   : > { %1221 = shalt.err (!%p1218_p12)
}
  0x2e   : > { %s1222_s22 = scalar_lea.vmem %s248_s18, 1024  ;;  %p1230_p5 = scmp.lt.s32.totalorder %s248_s18, %s248_s18 }
  0x2f   : > { %p1223_p13 = scmp.ne.s32.totalorder %s248_s18, %s1222_s22  ;;  %p1231_p2 = scmp.lt.s32.totalorder %s1222_s22, %s1222_s22 }
  0x31   : > { %p1225_p0 = pnand %p1223_p13, %p1724_p8  ;;  %p1232_p1 = por %p1231_p2, %p1230_p5 }
  0x33   : > { %p1226_p3 = pneg %p1225_p0 }
  0x35   : > { %p1233_p4 = pnand %p1232_p1, %p1226_p3 }
  0x37   : > { %1236 = shalt.err (!%p1233_p4)
}
  0x38   : > { %s2136_s10 = smov 64   ;;  %s2137_s11 = smov 4  }
  0x39   : > { %1031 = dma.hbm_to_vmem [thread:$0]  (!%p1710_p6), %s2170_s1, 1024, %s248_s18, [#allocation7], %s2136_s10, %s2136_s10, %s2137_s11  }
  0x3a   : > { %s2172_s3 = sld [smem:[#allocation33_spill]] }
  0x40   : > { %s1237_s6 = scalar_lea.hbm %s2172_s3, 16 }
  0x41   : > { %p1238_p1 = scmp.ne.s32.totalorder %s2172_s3, %s1237_s6  ;;  %p1244_p7 = scmp.lt.u32.totalorder %s1237_s6, %s2172_s3 }
  0x43   : > { %p1240_p2 = pnand %p1238_p1, %p1724_p8 }
  0x45   : > { %p1241_p4 = pneg %p1240_p2 }
  0x47   : > { %p1246_p9 = pnand %p1244_p7, %p1241_p4 }
  0x49   : > { %1249 = shalt.err (!%p1246_p9)
}
  0x4a   : > { %s1250_s18 = scalar_lea.vmem %s1714_s21, 16  ;;  %s1257_s0 = scalar_lea.vmem %s1714_s21, 32 }
  0x4b   : > { %p1251_p10 = scmp.ne.s32.totalorder %s1714_s21, %s1250_s18  ;;  %p1258_p13 = scmp.lt.s32.totalorder %s1714_s21, %s1714_s21 }
  0x4c   : > { %p1259_p0 = scmp.lt.s32.totalorder %s1257_s0, %s1250_s18 }
  0x4d   : > { %p1253_p11 = pnand %p1251_p10, %p1724_p8 }
  0x4e   : > { %p1260_p3 = por %p1259_p0, %p1258_p13 }
  0x4f   : > { %p1254_p12 = pneg %p1253_p11 }
  0x51   : > { %p1261_p5 = pnand %p1260_p3, %p1254_p12 }
  0x53   : > { %1264 = shalt.err (!%p1261_p5)
}
  0x54   : > { %1037 = dma.hbm_to_vmem [thread:$0]  (!%p1710_p6), %s2172_s3, 16, %s1714_s21, [#allocation10]  }
  0x55   : > { %p2139_p1 = scmp.eq.s32.totalorder %s1569_s14, 0  ;;  %p164_p2 = scmp.ne.s32.totalorder %s1537_s29, %s1533_s28 }
  0x56   : > { %p170_p4 = scmp.ne.s32.totalorder %s1533_s28, %s1529_s27  ;;  %p2138_p7 = scmp.lt.s32.totalorder %s1569_s14, 4 }
  0x57   : > { %p166_p9 = por %p164_p2, %p2139_p1  ;;  %s312_s7 = sand.u32 1, %s1569_s14  }
  0x58   : > { %p2173_p10 = scmp.eq.s32.totalorder %s1696_s15, 0  ;;  %s2135_s23 = sand.u32 1, %s1537_s29  }
  0x59   : > { %s945_s20 = sshll.u32 %s1561_s12, 10  ;;  %s907_s22 = sshll.u32 %s2135_s23, 6 }
  0x5a   : > { %p1779_p11 = por %p170_p4, %p2173_p10  ;;  %s2176_s5 = sld [smem:[#allocation35_spill]] }
  0x5b   : > { %p1794_p12 = pnand %p2138_p7, %p166_p9  ;;  %s316_s6 = scalar_lea.vmem [#allocation12], %s907_s22 }
  0x5c   : > { %s2174_s16 = scalar_select %p1779_p11, 1, 0 }
  0x5d   : > { %s2177_s27 = scalar_select %p1794_p12, 1, 0 }
  0x5e   : > { %2175 = sst [smem:[#allocation27_spill]] %s2174_s16  ;;  %s323_s24 = sshll.u32 %s316_s6, 4  ;;  %s1798_s24 = int_to_ptr.vmem [resolvable:$true] %s323_s24 }
  0x5f   : > { %s1800_s23 = scalar_lea.sflag [#allocation13], %s312_s7  ;;  %p2145_p0 = pneg %p1794_p12 }
  0x60   : > { %s1790_s21 = scalar_lea.hbm %s2176_s5, %s945_s20  ;;  %s1270_s25 = scalar_lea.hbm %s2176_s5, 2048 }
  0x61   : > { %s1265_s18 = scalar_lea.hbm %s1790_s21, 1024  ;;  %p1271_p2 = scmp.lt.u32.totalorder %s1790_s21, %s2176_s5 }
  0x62   : > { %p1266_p13 = scmp.ne.s32.totalorder %s1790_s21, %s1265_s18  ;;  %p1272_p4 = scmp.lt.u32.totalorder %s1270_s25, %s1265_s18 }
  0x63   : > { %p1274_p10 = scmp.lt.u32.totalorder %s1265_s18, %s1790_s21 }
  0x64   : > { %p1268_p3 = pnand %p2145_p0, %p1266_p13  ;;  %p1273_p9 = por %p1272_p4, %p1271_p2 }
  0x66   : > { %p1269_p5 = pneg %p1268_p3  ;;  %p1275_p7 = por %p1274_p10, %p1273_p9 }
  0x68   : > { %p1276_p1 = pnand %p1275_p7, %p1269_p5 }
  0x6a   : > { %1279 = shalt.err (!%p1276_p1)
}
  0x6b   : > { %s1280_s7 = scalar_lea.vmem %s1798_s24, 1024  ;;  %s1575_s22 = smov [#allocation12]  }
  0x6c   : > { %p1281_p13 = scmp.ne.s32.totalorder %s1798_s24, %s1280_s7  ;;  %s1285_s6 = sshll.u32 %s1575_s22, 4  ;;  %s1286_s6 = int_to_ptr.vmem [resolvable:$false] %s1285_s6 }
  0x6d   : > { %s1287_s10 = scalar_lea.vmem %s1286_s6, 2048  ;;  %p1288_p6 = scmp.lt.s32.totalorder %s1798_s24, %s1286_s6 }
  0x6e   : > { %p1283_p3 = pnand %p1281_p13, %p2145_p0  ;;  %p1289_p2 = scmp.lt.s32.totalorder %s1287_s10, %s1280_s7 }
  0x70   : > { %p1284_p11 = pneg %p1283_p3  ;;  %p1290_p4 = por %p1289_p2, %p1288_p6 }
  0x72   : > { %p1291_p9 = pnand %p1290_p4, %p1284_p11 }
  0x74   : > { %1294 = shalt.err (!%p1291_p9)
}
  0x75   : > { %s2178_s11 = smov 4   ;;  %s2179_s25 = smov 64  }
  0x76   : > { %1047 = dma.hbm_to_vmem [thread:$0]  (!%p1794_p12), %s1790_s21, 1024, %s1798_s24, %s1800_s23, %s2179_s25, %s2179_s25, %s2178_s11  }
  0x77   : > { %s1576_s18 = smov [#allocation8]   ;;  %s1577_s0 = smov [#allocation11]  }
  0x78   : > { %s261_s20 = sshll.u32 %s1576_s18, 4  ;;  %s283_s22 = sshll.u32 %s1577_s0, 4  ;;  %s262_s20 = int_to_ptr.vmem [resolvable:$true] %s261_s20  ;;  %s284_s22 = int_to_ptr.vmem [resolvable:$true] %s283_s22 }
  0x79   : > { %s2180_s2 = sld [smem:[#allocation32_spill]] }
  0x7f   : > { %s1295_s10 = scalar_lea.hbm %s2180_s2, 16 }
  0x80   : > { %p1296_p6 = scmp.ne.s32.totalorder %s2180_s2, %s1295_s10  ;;  %p1302_p11 = scmp.lt.u32.totalorder %s1295_s10, %s2180_s2 }
  0x82   : > { %p1298_p1 = pnand %p1296_p6, %p1724_p8 }
  0x84   : > { %p1299_p7 = pneg %p1298_p1 }
  0x86   : > { %p1304_p5 = pnand %p1302_p11, %p1299_p7 }
  0x88   : > { %1307 = shalt.err (!%p1304_p5)
}
  0x89   : > { %s1308_s21 = scalar_lea.vmem %s262_s20, 16  ;;  %s1315_s24 = scalar_lea.vmem %s262_s20, 32 }
  0x8a   : > { %p1309_p10 = scmp.ne.s32.totalorder %s262_s20, %s1308_s21  ;;  %p1316_p2 = scmp.lt.s32.totalorder %s262_s20, %s262_s20 }
  0x8b   : > { %p1317_p4 = scmp.lt.s32.totalorder %s1315_s24, %s1308_s21 }
  0x8c   : > { %p1311_p13 = pnand %p1309_p10, %p1724_p8 }
  0x8d   : > { %p1318_p9 = por %p1317_p4, %p1316_p2 }
  0x8e   : > { %p1312_p3 = pneg %p1311_p13 }
  0x90   : > { %p1319_p0 = pnand %p1318_p9, %p1312_p3 }
  0x92   : > { %1322 = shalt.err (!%p1319_p0)
}
  0x93   : > { %p2181_p6 = scmp.ne.s32.totalorder %s2169_s19, 0  ;;  %s2182_s4 = sld [smem:[#allocation34_spill]] }
  0x95   : > { %1034 = dma.hbm_to_vmem [thread:$0]  (!%p2181_p6), %s2180_s2, 16, %s262_s20, [#allocation7]  }
  0x99   : > { %s1323_s11 = scalar_lea.hbm %s2182_s4, 16 }
  0x9a   : > { %p1324_p1 = scmp.ne.s32.totalorder %s2182_s4, %s1323_s11  ;;  %p1330_p0 = scmp.lt.u32.totalorder %s1323_s11, %s2182_s4 }
  0x9c   : > { %p1326_p7 = pnand %p1324_p1, %p1724_p8 }
  0x9e   : > { %p1327_p11 = pneg %p1326_p7 }
  0xa0   : > { %p1332_p5 = pnand %p1330_p0, %p1327_p11 }
  0xa2   : > { %1335 = shalt.err (!%p1332_p5)
}
  0xa3   : > { %s1336_s7 = scalar_lea.vmem %s284_s22, 16  ;;  %s1343_s20 = scalar_lea.vmem %s284_s22, 32 }
  0xa4   : > { %p1337_p10 = scmp.ne.s32.totalorder %s284_s22, %s1336_s7  ;;  %p1344_p2 = scmp.lt.s32.totalorder %s284_s22, %s284_s22 }
  0xa5   : > { %p1345_p4 = scmp.lt.s32.totalorder %s1343_s20, %s1336_s7 }
  0xa6   : > { %p1339_p13 = pnand %p1337_p10, %p1724_p8 }
  0xa7   : > { %p1346_p9 = por %p1345_p4, %p1344_p2 }
  0xa8   : > { %p1340_p3 = pneg %p1339_p13 }
  0xaa   : > { %p1347_p12 = pnand %p1346_p9, %p1340_p3 }
  0xac   : > { %1350 = shalt.err (!%p1347_p12)
}
  0xad   : > { %1040 = dma.hbm_to_vmem [thread:$0]  (!%p2181_p6), %s2182_s4, 16, %s284_s22, [#allocation10]  }
  0xae   : > { %s898_s17 = sadd.s32 4294967294, %s1569_s14   ;;  %s37_s19 = sadd.s32 1, %s1561_s12 }
  0xaf   : > { %s40_s24 = sadd.s32 1, %s1565_s13  ;;  %s2183_s1 = sld [smem:[#allocation22_spill]] }
  0xb0   : > { %p38_p8 = scmp.ge.s32.totalorder %s37_s19, 2  ;;  %s47_s3 = sadd.s32 1, %s1549_s9 }
  0xb1   : > { %p54_p12 = scmp.ne.s32.totalorder %s1549_s9, %s1545_s8  ;;  %p60_p1 = scmp.ne.s32.totalorder %s1545_s8, %s1541_s30 }
  0xb2   : > { %s2238_s19 = smov (%p38_p8, %s37_s19), 0  ;;  %s2240_s24 = smov (!%p38_p8, %s40_s24), %s1565_s13 }
  0xb3   : > { %2184 = sst [smem:[#allocation28_spill]] %s2238_s19  ;;  %p2185_p7 = scmp.eq.s32.totalorder %s1569_s14, 0 }
  0xb4   : > { %p2187_p11 = scmp.eq.s32.totalorder %s1696_s15, 0  ;;  %s2188_s5 = sld [smem:[#allocation21_spill]] }
  0xb5   : > { %p1880_p6 = por %p2185_p7, %p54_p12  ;;  %p42_p5 = scmp.ge.s32.totalorder %s2240_s24, 2 }
  0xb6   : > { %p1886_p0 = por %p2187_p11, %p60_p1  ;;  %s154_s30 = ssub.s32 %s1561_s12, %s2238_s19 }
  0xb7   : > { %p155_p10 = scmp.eq.s32.totalorder %s154_s30, 0  ;;  %s211_s11 = sadd.s32 1, %s1525_s26 }
  0xb8   : > { %s2189_s16 = scalar_select %p1886_p0, 1, 0 }
  0xb9   : > { %s2242_s24 = smov (%p42_p5, %s2240_s24), 0  ;;  %s2191_s25 = sadd.s32 1, %s1537_s29 }
  0xba   : > { %2190 = sst [smem:[#allocation29_spill]] %s2242_s24  ;;  %s44_s0 = ssub.s32 %s1565_s13, %s2242_s24 }
  0xbb   : > { %s1898_s18 = scalar_select %p155_p10, %s1537_s29, %s2191_s25  }
  0xbc   : > { %p221_p13 = scmp.ne.s32.totalorder %s1525_s26, %s2183_s1  ;;  %p45_p3 = scmp.eq.s32.totalorder %s44_s0, 0 }
  0xbd   : > { %s208_s6 = sor.u32 %s154_s30, %s44_s0  ;;  %p2192_p4 = scmp.eq.s32.totalorder %s1696_s15, 3 }
  0xbe   : > { %p209_p2 = scmp.eq.s32.totalorder %s208_s6, 0  ;;  %p227_p8 = scmp.ne.s32.totalorder %s2183_s1, %s2188_s5 }
  0xbf   : > { %p1906_p9 = por %p2192_p4, %p221_p13  ;;  %p228_p12 = scmp.eq.s32.totalorder %s898_s17, 3 }
  0xc0   : > { %s1911_s20 = scalar_select %p45_p3, %s1549_s9, %s47_s3  }
  0xc1   : > { %s2193_s7 = scalar_select %p1906_p9, 1, 0 }
  0xc2   : > { %s1914_s10 = scalar_select %p209_p2, %s1525_s26, %s211_s11  }
  0xc3   : > { %s294_s21 = sand.u32 1, %s1549_s9   ;;  %s906_s25 = sshll.u32 %s1565_s13, 7 }
  0xc4   : > { %p1920_p1 = por %p228_p12, %p227_p8  ;;  %s905_s4 = sshll.u32 %s294_s21, 3 }
  0xc5   : > { %s2195_s6 = sld [smem:[#allocation30_spill]]  ;;  %p2196_p7 = scmp.lt.s32.totalorder %s1569_s14, 4 }
  0xc6   : > { %s2194_s2 = scalar_select %p1920_p1, 1, 0 }
  0xc7   : > { %p1933_p11 = pnand %p2196_p7, %p1880_p6  ;;  %s298_s1 = scalar_lea.vmem [#allocation3], %s905_s4 }
  0xc8   : > { %s305_s3 = sshll.u32 %s298_s1, 4  ;;  %s295_s5 = scalar_lea.sflag [#allocation4], %s294_s21  ;;  %s1937_s3 = int_to_ptr.vmem [resolvable:$true] %s305_s3 }
  0xc9   : > { %p1353_p10 = pneg %p1933_p11 }
  0xcb   : > { %s1927_s24 = scalar_lea.hbm %s2195_s6, %s906_s25  ;;  %s1356_s30 = scalar_lea.hbm %s2195_s6, 256 }
  0xcc   : > { %s1351_s11 = scalar_lea.hbm %s1927_s24, 128  ;;  %p1357_p6 = scmp.lt.u32.totalorder %s1927_s24, %s2195_s6 }
  0xcd   : > { %p1352_p5 = scmp.ne.s32.totalorder %s1927_s24, %s1351_s11  ;;  %p1358_p2 = scmp.lt.u32.totalorder %s1356_s30, %s1351_s11 }
  0xce   : > { %p1360_p8 = scmp.lt.u32.totalorder %s1351_s11, %s1927_s24 }
  0xcf   : > { %p1354_p13 = pnand %p1353_p10, %p1352_p5  ;;  %p1359_p4 = por %p1358_p2, %p1357_p6 }
  0xd1   : > { %p1355_p3 = pneg %p1354_p13  ;;  %p1361_p12 = por %p1360_p8, %p1359_p4 }
  0xd3   : > { %p1362_p7 = pnand %p1361_p12, %p1355_p3 }
  0xd5   : > { %1365 = shalt.err (!%p1362_p7)
}
  0xd6   : > { %s1366_s4 = scalar_lea.vmem %s1937_s3, 128  ;;  %s1578_s21 = smov [#allocation3]  }
  0xd7   : > { %p1367_p5 = scmp.ne.s32.totalorder %s1937_s3, %s1366_s4  ;;  %s1371_s1 = sshll.u32 %s1578_s21, 4  ;;  %s1372_s1 = int_to_ptr.vmem [resolvable:$false] %s1371_s1 }
  0xd8   : > { %s1373_s19 = scalar_lea.vmem %s1372_s1, 256  ;;  %p1374_p9 = scmp.lt.s32.totalorder %s1937_s3, %s1372_s1 }
  0xd9   : > { %p1369_p13 = pnand %p1367_p5, %p1353_p10  ;;  %p1375_p6 = scmp.lt.s32.totalorder %s1373_s19, %s1366_s4 }
  0xdb   : > { %p1370_p1 = pneg %p1369_p13  ;;  %p1376_p2 = por %p1375_p6, %p1374_p9 }
  0xdd   : > { %p1377_p4 = pnand %p1376_p2, %p1370_p1 }
  0xdf   : > { %1380 = shalt.err (!%p1377_p4)
}
  0xe0   : > { %1044 = dma.hbm_to_vmem [thread:$0]  (!%p1933_p11), %s1927_s24, 128, %s1937_s3, %s295_s5  }
  0xe1   : > { %s910_s11 = sshll.u32 %s1561_s12, 4  ;;  %s2198_s22 = sand.u32 1, %s1537_s29  }
  0xe2   : > { %s336_s25 = scalar_lea.vmem [#allocation14], %s2198_s22  ;;  %s2199_s6 = sld [smem:[#allocation36_spill]] }
  0xe3   : > { %s343_s30 = sshll.u32 %s336_s25, 4  ;;  %p2200_p1 = scmp.ne.s32.totalorder %s2177_s27, 0  ;;  %s344_s30 = int_to_ptr.vmem [resolvable:$true] %s343_s30 }
  0xe5   : > { %p2201_p10 = pneg %p2200_p1 }
  0xe8   : > { %s341_s1 = scalar_lea.hbm %s2199_s6, %s910_s11  ;;  %s1386_s13 = scalar_lea.hbm %s2199_s6, 32 }
  0xe9   : > { %s1381_s4 = scalar_lea.hbm %s341_s1, 16  ;;  %p1387_p11 = scmp.lt.u32.totalorder %s341_s1, %s2199_s6 }
  0xea   : > { %p1382_p9 = scmp.ne.s32.totalorder %s341_s1, %s1381_s4  ;;  %p1388_p12 = scmp.lt.u32.totalorder %s1386_s13, %s1381_s4 }
  0xeb   : > { %p1390_p5 = scmp.lt.u32.totalorder %s1381_s4, %s341_s1 }
  0xec   : > { %p1384_p3 = pnand %p1382_p9, %p2201_p10  ;;  %p1389_p7 = por %p1388_p12, %p1387_p11 }
  0xee   : > { %p1385_p8 = pneg %p1384_p3  ;;  %p1391_p13 = por %p1390_p5, %p1389_p7 }
  0xf0   : > { %p1392_p6 = pnand %p1391_p13, %p1385_p8 }
  0xf2   : > { %1395 = shalt.err (!%p1392_p6)
}
  0xf3   : > { %s1396_s5 = scalar_lea.vmem %s344_s30, 16  ;;  %p2202_p4 = pmov %p2201_p10 }
  0xf4   : > { %p1397_p2 = scmp.ne.s32.totalorder %s344_s30, %s1396_s5  ;;  %s1579_s11 = smov [#allocation14]  }
  0xf5   : > { %s1401_s22 = sshll.u32 %s1579_s11, 4  ;;  %s1402_s22 = int_to_ptr.vmem [resolvable:$false] %s1401_s22 }
  0xf6   : > { %p1399_p9 = pnand %p1397_p2, %p2202_p4  ;;  %s1403_s25 = scalar_lea.vmem %s1402_s22, 32 }
  0xf7   : > { %p1404_p3 = scmp.lt.s32.totalorder %s344_s30, %s1402_s22  ;;  %p1405_p0 = scmp.lt.s32.totalorder %s1403_s25, %s1396_s5 }
  0xf8   : > { %p1400_p10 = pneg %p1399_p9 }
  0xf9   : > { %p1406_p11 = por %p1405_p0, %p1404_p3 }
  0xfb   : > { %p1407_p12 = pnand %p1406_p11, %p1400_p10 }
  0xfd   : > { %1410 = shalt.err (!%p1407_p12)
}
  0xfe   : > { %1050 = dma.hbm_to_vmem [thread:$0]  (!%p2200_p1), %s341_s1, 16, %s344_s30, %s1800_s23  }
  0xff   : > { %s2203_s13 = sld [smem:[#allocation26_spill]] }
 0x105   : > { %p2204_p8 = scmp.ne.s32.totalorder %s2203_s13, 0 }
 0x106   : > { %s354_s0 = sand.u32 (!%p2204_p8), 1, %s1545_s8   ;;  %p2205_p7 = scmp.ne.s32.totalorder (!%p2204_p8), %s2189_s16, 0 }
 0x107   : > { %352 = sbr.rel (%p2204_p8) target bundleno = 1228 (0x4cc), region = 48  ;;  %s1988_s21 = sshll.u32 (!%p2204_p8), %s354_s0, 3 }
 0x108   : > { %s355_s4 = scalar_lea.sflag (!%p2204_p8), [#allocation4], %s354_s0  ;;  %s358_s17 = scalar_lea.vmem (!%p2204_p8), [#allocation3], %s1988_s21 }
 0x10e   : > { %1496 = dma.done.wait (%p2205_p7), %s355_s4, 128  }
 0x10f   : > { %1498 = vsyncadd (%p2205_p7), %s355_s4, 4294967168  ;;  %p2206_p0 = scmp.eq.s32.totalorder %s1696_s15, 0 }
 0x111   : > { %1500 = dma.done.wait (%p2206_p0), [#allocation7], 1040   ;;  %p2207_p1 = pmov %p2206_p0 }
 0x112   : > { %p2208_p5 = pmov %p2206_p0 }
 0x113   : > { %1502 = vsyncadd (%p2207_p1), [#allocation7], 4294966256 }
 0x114   : > { %1504 = dma.done.wait (%p2208_p5), [#allocation10], 32   ;;  %p2209_p13 = pmov %p2206_p0 }
 0x115   : > { %s2210_s23 = sld [smem:[#allocation27_spill]]  ;;  %s379_s27 = sand.u32 1, %s1696_s15  }
 0x116   : > { %1506 = vsyncadd (%p2209_p13), [#allocation10], 4294967264  ;;  %s381_s30 = sand.u32 1, %s1533_s28   ;;  %s380_s16 = scalar_lea.sflag [#allocation13], %s379_s27 }
 0x117   : > { %s917_s1 = sshll.u32 %s381_s30, 6 }
 0x118   : > { %s2005_s19 = scalar_lea.vmem [#allocation12], %s917_s1 }
 0x11b   : > { %p2211_p6 = scmp.ne.s32.totalorder %s2210_s23, 0 }
 0x11d   : > { %1508 = dma.done.wait (%p2211_p6), %s380_s16, 1040  }
 0x11e   : > { %1510 = vsyncadd (%p2211_p6), %s380_s16, 4294966256  ;;  %s2212_s24 = sld [smem:[#allocation22_spill]]  ;;  %s2016_s11 = scalar_lea.vmem [#allocation14], %s381_s30 }
 0x11f   : > { %s2213_s22 = sld [smem:[#allocation23_spill]] }
 0x124   : > { %s428_s3 = sand.u32 1, %s2212_s24  }
 0x125   : > { %s2014_s5 = sshll.u32 %s428_s3, 3  ;;  %p919_p2 = scmp.ne.s32.totalorder %s2213_s22, 0 }
 0x126   : > { %s430_s15 = scalar_lea.vmem [#allocation15], %s2014_s5  ;;  %v1187_v0 = vld [vmem:[#allocation6] sm:$0xff] (!%p919_p2)   ;;  %v1580_v1 = vmov (!%p919_p2), 0.0   ;;  %vm1581_vm0 = vmmov (!%p919_p2), 0   ;;  %v1188_v2 = vld [vmem:[#allocation6 + $0x8] sm:$0xff] (!%p919_p2)   ;;  %v1189_v3 = vld [vmem:[#allocation6 + $0x10] sm:$0xff] (!%p919_p2)  }
 0x127   : > { %436 = sbr.rel (%p919_p2) target bundleno = 935 (0x3a7), region = 80  ;;  %964 = vmatprep.subr.bf16.mxu0 (!%p919_p2), %v1580_v1  ;;  %980 = vmatprep.mubr.msk.bf16.mxu0 (!%p919_p2), %vm1581_vm0, %v1580_v1  ;;  %v1190_v4 = vld [vmem:[#allocation6 + $0x18] sm:$0xff] (!%p919_p2)   ;;  %v1191_v5 = vld [vmem:[#allocation6 + $0x20] sm:$0xff] (!%p919_p2)   ;;  %v1192_v6 = vld [vmem:[#allocation6 + $0x28] sm:$0xff] (!%p919_p2)  }
 0x128   : > { %965 = vmatpush3.bf16.xpose.msra.mxu0 (!%p919_p2), %v1187_v0  ;;  %v1193_v7 = vld [vmem:[#allocation6 + $0x30] sm:$0xff] (!%p919_p2)   ;;  %v1194_v8 = vld [vmem:[#allocation6 + $0x38] sm:$0xff] (!%p919_p2)   ;;  %v920_v11 = vld [vmem:[#allocation8] ss:$0 sm:$0xff] (!%p919_p2) }
 0x129   : > { %966 = vmatprep.subr.bf16.mxu0 (!%p919_p2), %v1580_v1  ;;  %v437_v9 = vld [vmem:[%s358_s17] sm:$0xff] (!%p919_p2)  ;;  %v929_v50 = vld [vmem:[#allocation9] ss:$0 sm:$0xff] (!%p919_p2)  ;;  %v930_v52 = vld [vmem:[#allocation11] ss:$0 sm:$0xff] (!%p919_p2) }
 0x12a   : > { %v438_v10 = vpack.c.bf16 (!%p919_p2), %v437_v9, %v437_v9 }
 0x130   : > { %967 = vmatpush3.bf16.xpose.msra.mxu0 %v1188_v2 }
 0x131   : > { %968 = vmatprep.subr.bf16.mxu0 %v1580_v1 }
 0x138   : > { %969 = vmatpush3.bf16.xpose.msra.mxu0 %v1189_v3 }
 0x139   : > { %970 = vmatprep.subr.bf16.mxu0 %v1580_v1 }
 0x140   : > { %971 = vmatpush3.bf16.xpose.msra.mxu0 %v1190_v4 }
 0x141   : > { %972 = vmatprep.subr.bf16.mxu0 %v1580_v1 }
 0x148   : > { %973 = vmatpush3.bf16.xpose.msra.mxu0 %v1191_v5 }
 0x149   : > { %974 = vmatprep.subr.bf16.mxu0 %v1580_v1 }
 0x150   : > { %975 = vmatpush3.bf16.xpose.msra.mxu0 %v1192_v6 }
 0x151   : > { %976 = vmatprep.subr.bf16.mxu0 %v1580_v1 }
 0x158   : > { %977 = vmatpush3.bf16.xpose.msra.mxu0 %v1193_v7 }
 0x159   : > { %978 = vmatprep.subr.bf16.mxu0 %v1580_v1 }
 0x160   : > { %979 = vmatpush3.bf16.xpose.msra.mxu0 %v1194_v8 }
 0x167   : > { %981 = vmatmul.mubr.bf16.vlgmr.msra.gmra.mrb[0].mxu0 %v438_v10 }
 0x23a   : > { %v544_v12 = vpop.f32.mrb[0].mxu0 }
 0x23b   : > { %v545_v13 = vadd.f32 %v920_v11, %v544_v12  ;;  %v982_v14 = vpop.f32.mrb[1].mxu0 }
 0x23c   : > { %v547_v15 = vpop.f32.mrb[2].mxu0 }
 0x23d   : > { %v551_v16 = vmul.f32 0.70710677, %v545_v13  ;;  %v983_v17 = vpop.f32.mrb[3].mxu0  ;;  %v550_v39 = vmul.f32 0.5, %v545_v13 }
 0x23f   : > { %v552_v18 = vand.u32 2147483647, %v551_v16  ;;  %vm572_vm1 = vcmp.lt.f32.partialorder %v551_v16, 0.0 }
 0x241   : > { %v553_v19 = vmul.f32 0.3275911, %v552_v18  ;;  %v566_v21 = vsub.f32 0.0, %v552_v18 }
 0x243   : > { %v554_v20 = vadd.f32 1.0, %v553_v19  ;;  %v567_v23 = vmul.f32 %v566_v21, %v552_v18 }
 0x245   : > { %1195 = vrcp.f32 %v554_v20  ;;  %v568_v26 = vmul.f32 1.442695, %v567_v23 }
 0x247   : > { %1197 = vpow2.f32 %v568_v26 }
 0x24f   : > { %v1196_v22 = vpop.eup %1195 }
 0x250   : > { %v557_v24 = vmul.f32 1.0614054, %v1196_v22 }
 0x251   : > { %v1198_v34 = vpop.eup %1197 }
 0x252   : > { %v558_v25 = vadd.f32 -1.4531521, %v557_v24 }
 0x254   : > { %v559_v27 = vmul.f32 %v1196_v22, %v558_v25 }
 0x256   : > { %v560_v28 = vadd.f32 1.4214138, %v559_v27 }
 0x258   : > { %v561_v29 = vmul.f32 %v1196_v22, %v560_v28 }
 0x25a   : > { %v562_v30 = vadd.f32 -0.28449672, %v561_v29 }
 0x25c   : > { %v563_v31 = vmul.f32 %v1196_v22, %v562_v30 }
 0x25e   : > { %v564_v32 = vadd.f32 0.2548296, %v563_v31 }
 0x260   : > { %v565_v33 = vmul.f32 %v1196_v22, %v564_v32 }
 0x262   : > { %v570_v35 = vmul.f32 %v1198_v34, %v565_v33 }
 0x264   : > { %v571_v36 = vsub.f32 1.0, %v570_v35 }
 0x266   : > { %v573_v37 = vsub.f32 0.0, %v571_v36 }
 0x268   : > { %v574_v38 = vsel %vm572_vm1, %v573_v37, %v571_v36 }
 0x269   : > { %v575_v40 = vadd.f32 1.0, %v574_v38 }
 0x26b   : > { %v576_v41 = vmul.f32 %v575_v40, %v550_v39 }
 0x26d   : > { %577 = vadd.xlane.f32.xlu0 %v576_v41 }
 0x2fa   : > { %v578_v42 = vpop.xlane.xlu0 %577 }
 0x2fb   : > { %v580_v43 = vmul.f32 0.0078125, %v578_v42 }
 0x2fd   : > { %v581_v44 = vsub.f32 %v576_v41, %v580_v43 }
 0x2ff   : > { %v582_v45 = vmul.f32 %v581_v44, %v581_v44 }
 0x301   : > { %583 = vadd.xlane.f32.xlu0 %v582_v45 }
 0x38e   : > { %v584_v46 = vpop.xlane.xlu0 %583 }
 0x38f   : > { %v585_v47 = vmul.f32 0.0078125, %v584_v46 }
 0x391   : > { %v586_v48 = vadd.f32 1e-05, %v585_v47 }
 0x393   : > { %1199 = vrsqrt.f32 %v586_v48 }
 0x39d   : > { %v1200_v49 = vpop.eup %1199 }
 0x39e   : > { %v588_v51 = vmul.f32 %v1200_v49, %v581_v44 }
 0x3a0   : > { %v596_v53 = vmul.f32 %v929_v50, %v588_v51 }
 0x3a2   : > { %v604_v54 = vadd.f32 %v930_v52, %v596_v53 }
 0x3a4   : > { %v605_v55 = vpack.c.bf16 %v604_v54, %v604_v54 }
 0x3a6   : > { %606 = vst [vmem:[#allocation2] sm:$0xf] %v605_v55 }
 0x3a7 PF: > { %v1201_v56 = vld [vmem:[%s2005_s19] sm:$0xff]   ;;  %v1582_v57 = vmov 0.0   ;;  %vm1583_vm2 = vmmov 0   ;;  %v1202_v58 = vld [vmem:[%s2005_s19 + $0x8] sm:$0xff]   ;;  %v1203_v59 = vld [vmem:[%s2005_s19 + $0x10] sm:$0xff]   ;;  %s2214_s25 = sld [smem:[#allocation24_spill]] }
 0x3a8   : > { %984 = vmatprep.subr.bf16.mxu0 %v1582_v57  ;;  %1000 = vmatprep.mubr.msk.bf16.mxu0 %vm1583_vm2, %v1582_v57  ;;  %v1204_v60 = vld [vmem:[%s2005_s19 + $0x18] sm:$0xff]   ;;  %s2215_s13 = sld [smem:[#allocation23_spill]]  ;;  %v1205_v61 = vld [vmem:[%s2005_s19 + $0x20] sm:$0xff]   ;;  %v1206_v62 = vld [vmem:[%s2005_s19 + $0x28] sm:$0xff]   ;;  %s736_s23 = sshll.u32 %s430_s15, 4  ;;  %s2040_s23 = int_to_ptr.vmem [resolvable:$true] %s736_s23 }
 0x3a9   : > { %985 = vmatpush3.bf16.xpose.msra.mxu0 %v1201_v56  ;;  %v1207_v63 = vld [vmem:[%s2005_s19 + $0x30] sm:$0xff]   ;;  %v1208_v0 = vld [vmem:[%s2005_s19 + $0x38] sm:$0xff]   ;;  %v931_v2 = vld [vmem:[%s2016_s11] ss:$0 sm:$0xff]  ;;  %s2217_s1 = sld [smem:[#allocation37_spill]]  ;;  %s721_s19 = scalar_lea.sflag [#allocation5], %s428_s3 }
 0x3aa   : > { %986 = vmatprep.subr.bf16.mxu0 %v1582_v57  ;;  %s1411_s24 = scalar_lea.vmem %s2040_s23, 128  ;;  %p2218_p9 = scmp.ne.s32.totalorder %s2193_s7, 0 }
 0x3ab   : > { %p1412_p4 = scmp.ne.s32.totalorder %s2040_s23, %s1411_s24  ;;  %s1584_s11 = smov [#allocation15]  }
 0x3ac   : > { %s1415_s22 = sshll.u32 %s1584_s11, 4  ;;  %s1416_s22 = int_to_ptr.vmem [resolvable:$false] %s1415_s22 }
 0x3ad   : > { %v607_v1 = vld [vmem:[#allocation2] sm:$0xf]  ;;  %s941_s21 = sshll.u32 %s2214_s25, 1  ;;  %p1413_p10 = pnand %p1412_p4, %p2218_p9 }
 0x3ae   : > { %s732_s4 = sadd.s32 %s2215_s13, %s941_s21  ;;  %s1417_s25 = scalar_lea.vmem %s1416_s22, 256 }
 0x3af   : > { %s942_s17 = sshll.u32 %s732_s4, 7  ;;  %p1414_p3 = pneg %p1413_p10 }
 0x3b0   : > { %s2038_s16 = scalar_lea.hbm %s2217_s1, %s942_s17  ;;  %p1418_p11 = scmp.lt.s32.totalorder %s2040_s23, %s1416_s22 }
 0x3b1   : > { %987 = vmatpush3.bf16.xpose.msra.mxu0 %v1202_v58  ;;  %p1419_p12 = scmp.lt.s32.totalorder %s1417_s25, %s1411_s24 }
 0x3b2   : > { %988 = vmatprep.subr.bf16.mxu0 %v1582_v57 }
 0x3b3   : > { %p1420_p8 = por %p1419_p12, %p1418_p11 }
 0x3b5   : > { %p1421_p7 = pnand %p1420_p8, %p1414_p3 }
 0x3b9   : > { %989 = vmatpush3.bf16.xpose.msra.mxu0 %v1203_v59 }
 0x3ba   : > { %990 = vmatprep.subr.bf16.mxu0 %v1582_v57 }
 0x3c1   : > { %991 = vmatpush3.bf16.xpose.msra.mxu0 %v1204_v60 }
 0x3c2   : > { %992 = vmatprep.subr.bf16.mxu0 %v1582_v57 }
 0x3c9   : > { %993 = vmatpush3.bf16.xpose.msra.mxu0 %v1205_v61 }
 0x3ca   : > { %994 = vmatprep.subr.bf16.mxu0 %v1582_v57 }
 0x3d1   : > { %995 = vmatpush3.bf16.xpose.msra.mxu0 %v1206_v62 }
 0x3d2   : > { %996 = vmatprep.subr.bf16.mxu0 %v1582_v57 }
 0x3d9   : > { %997 = vmatpush3.bf16.xpose.msra.mxu0 %v1207_v63 }
 0x3da   : > { %998 = vmatprep.subr.bf16.mxu0 %v1582_v57 }
 0x3e1   : > { %999 = vmatpush3.bf16.xpose.msra.mxu0 %v1208_v0 }
 0x3e8   : > { %1001 = vmatmul.mubr.bf16.vlgmr.msra.gmra.mrb[0].mxu0 %v607_v1 }
 0x4bb   : > { %v713_v3 = vpop.f32.mrb[0].mxu0 }
 0x4bc   : > { %v714_v4 = vadd.f32 %v931_v2, %v713_v3  ;;  %v1002_v5 = vpop.f32.mrb[1].mxu0 }
 0x4bd   : > { %v716_v6 = vpop.f32.mrb[2].mxu0 }
 0x4be   : > { %719 = vst [vmem:[%s430_s15] sm:$0xff] %v714_v4  ;;  %v1003_v7 = vpop.f32.mrb[3].mxu0 }
 0x4bf   : > { %1424 = shalt.err (!%p1421_p7)
}
 0x4c0   : > { %s1425_s3 = scalar_lea.hbm %s2038_s16, 128  ;;  %s1429_s13 = scalar_lea.hbm %s2217_s1, 512 }
 0x4c1   : > { %p1426_p0 = scmp.ne.s32.totalorder %s2038_s16, %s1425_s3  ;;  %p1430_p13 = scmp.lt.u32.totalorder %s2038_s16, %s2217_s1 }
 0x4c2   : > { %p1431_p6 = scmp.lt.u32.totalorder %s1429_s13, %s1425_s3  ;;  %p1433_p4 = scmp.lt.u32.totalorder %s1425_s3, %s2038_s16 }
 0x4c3   : > { %p1427_p1 = pnand %p1426_p0, %p2218_p9 }
 0x4c4   : > { %p1432_p2 = por %p1431_p6, %p1430_p13 }
 0x4c5   : > { %p1428_p5 = pneg %p1427_p1 }
 0x4c6   : > { %p1434_p10 = por %p1433_p4, %p1432_p2 }
 0x4c8   : > { %p1435_p3 = pnand %p1434_p10, %p1428_p5 }
 0x4ca   : > { %1438 = shalt.err (!%p1435_p3)
}
 0x4cb   : > { %1026 = dma.vmem_to_hbm [thread:$0]  (%p2218_p9), %s2040_s23, 128, %s2038_s16, %s721_s19  }
 0x4cc PF: > { %s2219_s4 = sld [smem:[#allocation21_spill]]  ;;  %p1064_p11 = scmp.ge.s32.totalorder %s1569_s14, 2 }
 0x4cd   : > { %p2220_p12 = scmp.ne.s32.totalorder %s2194_s2, 0 }
 0x4cf   : > { %p1052_p8 = pnand %p1064_p11, %p2220_p12 }
 0x4d2   : > { %s748_s17 = sand.u32 1, %s2219_s4  }
 0x4d3   : > { %s749_s27 = scalar_lea.sflag [#allocation5], %s748_s17 }
 0x4d4   : > { %1512 = dma.done.wait (!%p1052_p8), %s749_s27, 128  }
 0x4d5   : > { %1514 = vsyncadd (!%p1052_p8), %s749_s27, 4294967168  ;;  %s28_s14 = sadd.s32 1, %s1569_s14   ;;  %s2222_s24 = sld [smem:[#allocation22_spill]] }
 0x4d6   : > { %p2072_p7 = scmp.ge.s32.totalorder %s28_s14, 6   ;;  %s2223_s11 = sld [smem:[#allocation25_spill]] }
 0x4d7   : > { %s2224_s2 = sld [smem:[#allocation28_spill]]  ;;  %s2225_s13 = sld [smem:[#allocation29_spill]] }
 0x4d8   : > { %s2227_s25 = smov %s1525_s26  ;;  %s2228_s26 = smov %s1914_s10 }
 0x4d9   : > { %s2229_s27 = smov %s1533_s28  ;;  %s2230_s28 = smov %s1537_s29 }
 0x4da   : > { %s2231_s29 = smov %s1898_s18  ;;  %s2232_s30 = smov %s1545_s8 }
 0x4db   : > { %s2233_s8 = smov %s1549_s9  ;;  %s2234_s9 = smov %s1911_s20 }
 0x4dc   : > { %s2235_s10 = smov %s1561_s12  ;;  %27 = sbr.rel (!%p2072_p7) target bundleno = 23 (0x17), region = 137 }
 0x4dd   : > { %s2236_s12 = smov %s2224_s2 }
 0x4e3   :  { %754 = vsyncpa [#allocation4], 1 }
 0x4e4   :  { %756 = vsyncpa [#allocation4 + $0x1], 1 }
 0x4e5   :  { %757 = vsyncpa [#allocation7], 1 }
 0x4e6   :  { %758 = vsyncpa [#allocation10], 1 }
 0x4e7   :  { %759 = vsyncpa [#allocation13], 1 }
 0x4e8   :  { %761 = vsyncpa [#allocation13 + $0x1], 1 }
 0x4e9   :  { %762 = vsyncpa [#allocation5], 1 }
 0x4ea   :  { %764 = vsyncpa [#allocation5 + $0x1], 1 }

</bundles_post_ra>
